<compile_context>
chip_gen: v5e
topology: v5e:2x2
jax: 0.10.0
libtpu: 0.0.40
codegen_flags: <defaults>
</compile_context>

<pallas_src>
import functools

import jax
import jax.numpy as jnp
from jax.experimental import pallas as pl
from jax.experimental.pallas import tpu as pltpu


# --------------------------------------------------------------------------- #
# Kernels
# --------------------------------------------------------------------------- #

def ffn_fused_kernel(x_ref, w1_ref, b1_ref, w2_ref, b2_ref, o_ref):
    """Single-pass FFN: full-width weights resident in VMEM, grid over rows."""
    h = jnp.dot(x_ref[...], w1_ref[...], preferred_element_type=jnp.float32)
    h = jnp.maximum(h + b1_ref[...], 0.0)          # bias (f32) + ReLU
    # dropout: identity (eval mode)
    out = jnp.dot(h.astype(w2_ref.dtype), w2_ref[...],
                  preferred_element_type=jnp.float32)
    o_ref[...] = (out + b2_ref[...]).astype(o_ref.dtype)


def ffn_tiled_kernel(x_ref, w1_ref, b1_ref, w2_ref, b2_ref, o_ref, acc_ref):
    """d_ff-tiled FFN for weights that do not fit VMEM: grid = (rows, d_ff)."""
    f = pl.program_id(1)

    @pl.when(f == 0)
    def _init():
        # Fold b2 into the accumulator exactly once per row tile.
        acc_ref[...] = jnp.broadcast_to(
            b2_ref[...].astype(jnp.float32), acc_ref.shape)

    h = jnp.dot(x_ref[...], w1_ref[...], preferred_element_type=jnp.float32)
    h = jnp.maximum(h + b1_ref[...], 0.0)          # bias (f32) + ReLU
    # dropout: identity (eval mode)
    acc_ref[...] += jnp.dot(h.astype(w2_ref.dtype), w2_ref[...],
                            preferred_element_type=jnp.float32)

    @pl.when(f == pl.num_programs(1) - 1)
    def _finalize():
        o_ref[...] = acc_ref[...].astype(o_ref.dtype)


# --------------------------------------------------------------------------- #
# Helpers
# --------------------------------------------------------------------------- #

def _round_up(x, m):
    return (x + m - 1) // m * m


def _vmem_capacity_bytes():
    """Per-core VMEM capacity; conservative 64 MiB fallback (v7x-safe)."""
    try:
        info = pltpu.get_tpu_info()
        cap = getattr(info, "vmem_capacity_bytes", None)
        if cap:
            return int(cap)
    except Exception:
        pass
    return 64 * 1024 * 1024


def _pad_to(a, rows, cols):
    pr, pc = rows - a.shape[0], cols - a.shape[1]
    if pr == 0 and pc == 0:
        return a
    return jnp.pad(a, ((0, pr), (0, pc)))


def _select_row_tile(rows_p8, desired):
    tm = max(8, min(_round_up(desired, 8), rows_p8))
    # v7x has 2 TensorCores: make sure the "parallel" row axis has >= 2 tiles
    # whenever there is enough work (costs one extra grid step elsewhere).
    if rows_p8 >= 16 and pl.cdiv(rows_p8, tm) < 2:
        tm = max(8, _round_up(pl.cdiv(rows_p8, 2), 8))
    return tm


def _tiled_bytes(tm, tf, dm_p, cd_size, out_size):
    w_blk = 2 * dm_p * tf * cd_size             # w1 + w2 tiles
    io_blk = tm * dm_p * (cd_size + out_size)   # x + out tiles
    b_blk = (tf + dm_p) * 4                     # biases (f32)
    acc = tm * dm_p * 4                         # f32 accumulator scratch
    inter = tm * tf * (4 + cd_size)             # h (f32) + cast copy
    return 2 * (w_blk + io_blk + b_blk) + acc + inter


# --------------------------------------------------------------------------- #
# Wrapper
# --------------------------------------------------------------------------- #

@functools.partial(
    jax.jit,
    static_argnames=("compute_dtype", "block_rows", "block_ff", "allow_fused"))
def positionwise_ffn(x, w1, b1, w2, b2, *, compute_dtype=jnp.bfloat16,
                     block_rows=None, block_ff=None, allow_fused=True):
    """x: (batch, seq, d_model) -> (out, None), mirroring the PyTorch forward.

    w1: (d_model, d_ff), b1: (d_ff,)/(1, d_ff)
    w2: (d_ff, d_model), b2: (d_model,)/(1, d_model)
    Weights are stored pre-transposed for `x @ W`.  compute_dtype controls the
    MXU operand dtype (bf16 default; f32 is exact); accumulation is f32.
    """
    batch, seq, d_model = x.shape
    d_ff = w1.shape[1]
    n_rows = batch * seq
    out_dtype = x.dtype

    cd = jnp.dtype(compute_dtype if compute_dtype is not None else x.dtype)
    cd_size = cd.itemsize
    out_size = jnp.dtype(out_dtype).itemsize

    # Lane-dense padding targets (multiples of 128 on every last dim).
    dm_p = _round_up(d_model, 128)
    df_p = _round_up(d_ff, 128)
    rows_p8 = _round_up(n_rows, 8)          # sublane only; no full-tile row pad

    # Per-generation VMEM budget (leave headroom for compiler scratch/spills).
    vmem_cap = _vmem_capacity_bytes()
    budget = int(vmem_cap * 0.8)            # ~107 MiB v5e/v6e, ~51 MiB v7x
    big_vmem = budget >= 96 * 1024 * 1024

    # Row tile selection.
    desired_tm = block_rows if block_rows is not None else (512 if big_vmem else 256)
    tm = _select_row_tile(rows_p8, desired_tm)

    # Decide fused (weights-resident) vs d_ff-tiled path.
    w_bytes = 2 * dm_p * df_p * cd_size
    b_bytes = (df_p + dm_p) * 4
    fused_bytes = (2 * (w_bytes + b_bytes)
                   + 2 * tm * dm_p * (cd_size + out_size)
                   + tm * df_p * (4 + cd_size))
    use_fused = allow_fused and fused_bytes <= budget

    # Inputs (cast to compute dtype; pad only when needed).
    x2d = _pad_to(x.reshape(n_rows, d_model).astype(cd), rows_p8, dm_p)
    w1c = w1.astype(cd)
    w2c = w2.astype(cd)
    b1f = b1.reshape(1, d_ff).astype(jnp.float32)
    b2f = _pad_to(b2.reshape(1, d_model).astype(jnp.float32), 1, dm_p)

    if use_fused:
        w1_p = _pad_to(w1c, dm_p, df_p)
        b1_p = _pad_to(b1f, 1, df_p)
        w2_p = _pad_to(w2c, df_p, dm_p)
        grid = (pl.cdiv(rows_p8, tm),)

        out_p = pl.pallas_call(
            ffn_fused_kernel,
            out_shape=jax.ShapeDtypeStruct((rows_p8, dm_p), out_dtype),
            grid_spec=pltpu.PrefetchScalarGridSpec(
                num_scalar_prefetch=0,
                grid=grid,
                in_specs=[
                    pl.BlockSpec((tm, dm_p), lambda i: (i, 0)),      # x rows
                    pl.BlockSpec((dm_p, df_p), lambda i: (0, 0)),    # w1 (resident)
                    pl.BlockSpec((1, df_p), lambda i: (0, 0)),       # b1
                    pl.BlockSpec((df_p, dm_p), lambda i: (0, 0)),    # w2 (resident)
                    pl.BlockSpec((1, dm_p), lambda i: (0, 0)),       # b2
                ],
                out_specs=pl.BlockSpec((tm, dm_p), lambda i: (i, 0)),
            ),
            compiler_params=pltpu.CompilerParams(
                dimension_semantics=("parallel",),
                vmem_limit_bytes=budget,
            ),
        )(x2d, w1_p, b1_p, w2_p, b2f)
    else:
        # d_ff-tiled fallback (reduction axis last, f32 resident accumulator).
        desired_tf = block_ff if block_ff is not None else (2048 if big_vmem else 1024)
        tf = max(128, min(_round_up(desired_tf, 128), df_p))
        while _tiled_bytes(tm, tf, dm_p, cd_size, out_size) > budget and tf > 128:
            tf = max(128, _round_up(tf // 2, 128))
        while _tiled_bytes(tm, tf, dm_p, cd_size, out_size) > budget and tm > 8:
            tm = max(8, _round_up(tm // 2, 8))
        df_pad = _round_up(df_p, tf)         # never drop d_ff columns

        w1_p = _pad_to(w1c, dm_p, df_pad)
        b1_p = _pad_to(b1f, 1, df_pad)
        w2_p = _pad_to(w2c, df_pad, dm_p)
        grid = (pl.cdiv(rows_p8, tm), df_pad // tf)
        # NOTE: if profiling shows exposed weight DMA here, deepen buffering on
        # the w1/w2 BlockSpecs (pipeline_mode=pl.Buffered(3)).

        out_p = pl.pallas_call(
            ffn_tiled_kernel,
            out_shape=jax.ShapeDtypeStruct((rows_p8, dm_p), out_dtype),
            grid_spec=pltpu.PrefetchScalarGridSpec(
                num_scalar_prefetch=0,
                grid=grid,
                in_specs=[
                    pl.BlockSpec((tm, dm_p), lambda i, f: (i, 0)),   # x rows
                    pl.BlockSpec((dm_p, tf), lambda i, f: (0, f)),   # w1 cols
                    pl.BlockSpec((1, tf), lambda i, f: (0, f)),      # b1 tile
                    pl.BlockSpec((tf, dm_p), lambda i, f: (f, 0)),   # w2 rows
                    pl.BlockSpec((1, dm_p), lambda i, f: (0, 0)),    # b2
                ],
                out_specs=pl.BlockSpec((tm, dm_p), lambda i, f: (i, 0)),
                scratch_shapes=[pltpu.VMEM((tm, dm_p), jnp.float32)],
            ),
            compiler_params=pltpu.CompilerParams(
                dimension_semantics=("parallel", "arbitrary"),
                vmem_limit_bytes=budget,
            ),
        )(x2d, w1_p, b1_p, w2_p, b2f)

    out2d = out_p[:n_rows, :d_model]
    return out2d.reshape(batch, seq, d_model), None


# --------------------------------------------------------------------------- #
# Self-test
# --------------------------------------------------------------------------- #

if __name__ == "__main__":
    # Small shapes consistent with the module: d_model=32, d_ff=64.
    batch, seq, d_model, d_ff = 2, 8, 32, 64

    key = jax.random.PRNGKey(0)
    kx, k1, kb1, k2, kb2, k3, kb3, k4, kb4 = jax.random.split(key, 9)

    x = jax.random.normal(kx, (batch, seq, d_model), dtype=jnp.float32)

    # nn.Linear-style init, weights stored pre-transposed for x @ W.
    lim1 = 1.0 / (d_model ** 0.5)
    lim2 = 1.0 / (d_ff ** 0.5)
    w1 = jax.random.uniform(k1, (d_model, d_ff), jnp.float32, -lim1, lim1)
    b1 = jax.random.uniform(kb1, (1, d_ff), jnp.float32, -lim1, lim1)
    w2 = jax.random.uniform(k2, (d_ff, d_model), jnp.float32, -lim2, lim2)
    b2 = jax.random.uniform(kb2, (1, d_model), jnp.float32, -lim2, lim2)

    ref = jnp.maximum(x @ w1 + b1[0], 0.0) @ w2 + b2[0]

    # 1) Exact f32 path (fused, weights resident in VMEM).
    out_f32, extra = positionwise_ffn(x, w1, b1, w2, b2,
                                      compute_dtype=jnp.float32)
    out_f32 = jax.block_until_ready(out_f32)
    assert extra is None
    assert out_f32.shape == (batch, seq, d_model)
    assert jnp.allclose(out_f32, ref, atol=1e-5, rtol=1e-5), "f32 fused mismatch"

    # 2) Default bf16-operand path (performance default; f32 accumulation).
    out_bf16, _ = positionwise_ffn(x, w1, b1, w2, b2)
    out_bf16 = jax.block_until_ready(out_bf16)
    assert jnp.allclose(out_bf16, ref, atol=5e-2, rtol=5e-2), "bf16 fused mismatch"

    # 3) Force the d_ff-tiled path (multiple row and d_ff tiles) to verify the
    #    accumulator / bias-fold logic used for large models.
    d_ff_big = 256
    lim2b = 1.0 / (d_ff_big ** 0.5)
    w1b = jax.random.uniform(k3, (d_model, d_ff_big), jnp.float32, -lim1, lim1)
    b1b = jax.random.uniform(kb3, (1, d_ff_big), jnp.float32, -lim1, lim1)
    w2b = jax.random.uniform(k4, (d_ff_big, d_model), jnp.float32, -lim2b, lim2b)
    b2b = jax.random.uniform(kb4, (1, d_model), jnp.float32, -lim2b, lim2b)

    out_tiled, _ = positionwise_ffn(x, w1b, b1b, w2b, b2b,
                                    compute_dtype=jnp.float32,
                                    allow_fused=False,
                                    block_rows=8, block_ff=128)
    out_tiled = jax.block_until_ready(out_tiled)
    ref_tiled = jnp.maximum(x @ w1b + b1b[0], 0.0) @ w2b + b2b[0]
    assert jnp.allclose(out_tiled, ref_tiled, atol=1e-5, rtol=1e-5), \
        "tiled path mismatch"

    print("KERNEL_OK")
</pallas_src>

<mosaic_0001>
module attributes {stable_mosaic.version = 11 : i64} {
  func.func @ffn_fused_kernel(%arg0: i32, %arg1: memref<8x128xf32, #tpu.memory_space<vmem>>, %arg2: memref<128x128xf32, #tpu.memory_space<vmem>>, %arg3: memref<1x128xf32, #tpu.memory_space<vmem>>, %arg4: memref<128x128xf32, #tpu.memory_space<vmem>>, %arg5: memref<1x128xf32, #tpu.memory_space<vmem>>, %arg6: memref<8x128xf32, #tpu.memory_space<vmem>>) attributes {dimension_semantics = [#tpu.dimension_semantics<parallel>], iteration_bounds = array<i64: 2>, scalar_prefetch = 0 : i64, scratch_operands = 0 : i64, tpu.core_type = #tpu.core_type<tc>, window_params = [{transform_indices = @transform_0, window_bounds = array<i64: 8, 128>}, {pipeline_mode = #tpu.pipeline_mode<synchronous>, transform_indices = @transform_1, window_bounds = array<i64: 128, 128>}, {pipeline_mode = #tpu.pipeline_mode<synchronous>, transform_indices = @transform_2, window_bounds = array<i64: 1, 128>}, {pipeline_mode = #tpu.pipeline_mode<synchronous>, transform_indices = @transform_3, window_bounds = array<i64: 128, 128>}, {pipeline_mode = #tpu.pipeline_mode<synchronous>, transform_indices = @transform_4, window_bounds = array<i64: 1, 128>}, {transform_indices = @transform_5, window_bounds = array<i64: 8, 128>}]} {
    %c0 = arith.constant 0 : index
    %c0_0 = arith.constant 0 : index
    %0 = vector.load %arg1[%c0, %c0_0] : memref<8x128xf32, #tpu.memory_space<vmem>>, vector<8x128xf32>
    %c0_1 = arith.constant 0 : index
    %c0_2 = arith.constant 0 : index
    %1 = vector.load %arg2[%c0_1, %c0_2] : memref<128x128xf32, #tpu.memory_space<vmem>>, vector<128x128xf32>
    %cst = arith.constant dense<0.000000e+00> : vector<8x128xf32>
    %2 = tpu.matmul %0, %1, %cst {dimension_numbers = #tpu.dot_dimension_numbers<[1], [0], [0], [1], [0, 0, 1, 1], [], []>} : vector<8x128xf32>, vector<128x128xf32>, vector<8x128xf32> -> vector<8x128xf32>
    %c0_3 = arith.constant 0 : index
    %c0_4 = arith.constant 0 : index
    %3 = vector.load %arg3[%c0_3, %c0_4] : memref<1x128xf32, #tpu.memory_space<vmem>>, vector<1x128xf32>
    %4 = vector.broadcast %3 : vector<1x128xf32> to vector<8x128xf32>
    %5 = arith.addf %2, %4 : vector<8x128xf32>
    %cst_5 = arith.constant 0.000000e+00 : f32
    %6 = vector.broadcast %cst_5 : f32 to vector<8x128xf32>
    %7 = arith.maximumf %5, %6 : vector<8x128xf32>
    %c0_6 = arith.constant 0 : index
    %c0_7 = arith.constant 0 : index
    %8 = vector.load %arg4[%c0_6, %c0_7] : memref<128x128xf32, #tpu.memory_space<vmem>>, vector<128x128xf32>
    %cst_8 = arith.constant dense<0.000000e+00> : vector<8x128xf32>
    %9 = tpu.matmul %7, %8, %cst_8 {dimension_numbers = #tpu.dot_dimension_numbers<[1], [0], [0], [1], [0, 0, 1, 1], [], []>} : vector<8x128xf32>, vector<128x128xf32>, vector<8x128xf32> -> vector<8x128xf32>
    %c0_9 = arith.constant 0 : index
    %c0_10 = arith.constant 0 : index
    %10 = vector.load %arg5[%c0_9, %c0_10] : memref<1x128xf32, #tpu.memory_space<vmem>>, vector<1x128xf32>
    %11 = vector.broadcast %10 : vector<1x128xf32> to vector<8x128xf32>
    %12 = arith.addf %9, %11 : vector<8x128xf32>
    %c0_11 = arith.constant 0 : index
    %c0_12 = arith.constant 0 : index
    %13 = vector.load %arg6[%c0_11, %c0_12] : memref<8x128xf32, #tpu.memory_space<vmem>>, vector<8x128xf32>
    tpu.vector_store %arg6[%c0_11, %c0_12], %12 {strides = array<i32>} : memref<8x128xf32, #tpu.memory_space<vmem>>, vector<8x128xf32>,
    return
  }
  func.func @transform_0(%arg0: i32) -> (i32, i32) {
    %c0_i32 = arith.constant 0 : i32
    %c0_i32_0 = arith.constant 0 : i32
    return %arg0, %c0_i32 : i32, i32
  }
  func.func @transform_1(%arg0: i32) -> (i32, i32) {
    %c0_i32 = arith.constant 0 : i32
    %c0_i32_0 = arith.constant 0 : i32
    %c0_i32_1 = arith.constant 0 : i32
    return %c0_i32, %c0_i32_0 : i32, i32
  }
  func.func @transform_2(%arg0: i32) -> (i32, i32) {
    %c0_i32 = arith.constant 0 : i32
    %c0_i32_0 = arith.constant 0 : i32
    %c0_i32_1 = arith.constant 0 : i32
    return %c0_i32, %c0_i32_0 : i32, i32
  }
  func.func @transform_3(%arg0: i32) -> (i32, i32) {
    %c0_i32 = arith.constant 0 : i32
    %c0_i32_0 = arith.constant 0 : i32
    %c0_i32_1 = arith.constant 0 : i32
    return %c0_i32, %c0_i32_0 : i32, i32
  }
  func.func @transform_4(%arg0: i32) -> (i32, i32) {
    %c0_i32 = arith.constant 0 : i32
    %c0_i32_0 = arith.constant 0 : i32
    %c0_i32_1 = arith.constant 0 : i32
    return %c0_i32, %c0_i32_0 : i32, i32
  }
  func.func @transform_5(%arg0: i32) -> (i32, i32) {
    %c0_i32 = arith.constant 0 : i32
    %c0_i32_0 = arith.constant 0 : i32
    return %arg0, %c0_i32 : i32, i32
  }
}

</mosaic_0001>

<bundles_post_ra>
// kernel: positionwise_ffn.1
= control target key start
LH: loop header
LB: loop body
LE: loop exit
PB: predicated region body
PF: predicated region fallthrough
CT: control target
= control target key end

     0   :  { %s413_s18 = smov 0   ;;  %s543_s0 = inlined_call_operand.vmem [shape: f32[16,128], index: 0, kind: input, shape index: {}]   ;;  %s544_s1 = inlined_call_operand.vmem [shape: f32[128,128], index: 1, kind: input, shape index: {}]   ;;  %s545_s2 = inlined_call_operand.vmem [shape: f32[1,128], index: 2, kind: input, shape index: {}]   ;;  %s546_s3 = inlined_call_operand.vmem [shape: f32[128,128], index: 3, kind: input, shape index: {}]   ;;  %s547_s4 = inlined_call_operand.vmem [shape: f32[1,128], index: 4, kind: input, shape index: {}]   ;;  %s548_s5 = inlined_call_operand.vmem [shape: f32[16,128], index: 5, kind: output, shape index: {}]  }
   0x1 LB: > { %s356_s19 = sadd.s32 4294967295, %s381_s18   ;;  %p360_p0 = scmp.ge.s32.totalorder %s381_s18, 1  ;;  %s381_s18 = sphi %s413_s18, %s15_s18  }
   0x2   : > { %p186_p1 = scmp.lt.s32.totalorder %s381_s18, 3 }
   0x4   : > { %p187_p2 = pnand %p360_p0, %p186_p1 }
   0x5   : > { %p212_p3 = scmp.lt.s32.totalorder (!%p187_p2), %s356_s19, 1 }
   0x6   : > { %190 = sbr.rel (%p187_p2) target bundleno = 302 (0x12e), region = 40 }
   0xb   : > { %v236_v0 = vld [vmem:[%s544_s1 + $0x78] sm:$0xff]  ;;  %v235_v1 = vld [vmem:[%s544_s1 + $0x70] sm:$0xff]  ;;  %v234_v2 = vld [vmem:[%s544_s1 + $0x68] sm:$0xff]  ;;  %s550_s19 = smov (!%p212_p3, %s356_s19), 1 }
   0xc   : > { %241 = vmatpush.msra.mxu0 %v236_v0  ;;  %v233_v3 = vld [vmem:[%s544_s1 + $0x60] sm:$0xff]  ;;  %v277_v4 = vld [vmem:[%s546_s3 + $0x78] sm:$0xff]  ;;  %v276_v5 = vld [vmem:[%s546_s3 + $0x70] sm:$0xff]  ;;  %s361_s20 = sshll.u32 %s550_s19, 3 }
   0xd   : > { %v232_v6 = vld [vmem:[%s544_s1 + $0x58] sm:$0xff]  ;;  %282 = vmatpush.msra.mxu1 %v277_v4  ;;  %v275_v7 = vld [vmem:[%s546_s3 + $0x68] sm:$0xff]  ;;  %v231_v8 = vld [vmem:[%s544_s1 + $0x50] sm:$0xff]  ;;  %s215_s6 = scalar_lea.vmem %s543_s0, %s361_s20  ;;  %s219_s26 = scalar_lea.vmem %s548_s5, %s361_s20 }
   0xe   : > { %242 = vmatpush.msra.mxu0 %v235_v1  ;;  %v274_v9 = vld [vmem:[%s546_s3 + $0x60] sm:$0xff]  ;;  %v230_v10 = vld [vmem:[%s544_s1 + $0x48] sm:$0xff]  ;;  %v273_v11 = vld [vmem:[%s546_s3 + $0x58] sm:$0xff] }
   0xf   : > { %283 = vmatpush.msra.mxu1 %v276_v5  ;;  %v229_v12 = vld [vmem:[%s544_s1 + $0x40] sm:$0xff]  ;;  %v272_v13 = vld [vmem:[%s546_s3 + $0x50] sm:$0xff]  ;;  %v228_v14 = vld [vmem:[%s544_s1 + $0x38] sm:$0xff] }
  0x10   : > { %243 = vmatpush.msra.mxu0 %v234_v2  ;;  %v271_v15 = vld [vmem:[%s546_s3 + $0x48] sm:$0xff]  ;;  %v227_v16 = vld [vmem:[%s544_s1 + $0x30] sm:$0xff]  ;;  %v270_v17 = vld [vmem:[%s546_s3 + $0x40] sm:$0xff] }
  0x11   : > { %284 = vmatpush.msra.mxu1 %v275_v7  ;;  %v226_v18 = vld [vmem:[%s544_s1 + $0x28] sm:$0xff]  ;;  %v269_v19 = vld [vmem:[%s546_s3 + $0x38] sm:$0xff]  ;;  %v225_v20 = vld [vmem:[%s544_s1 + $0x20] sm:$0xff] }
  0x12   : > { %244 = vmatpush.msra.mxu0 %v233_v3  ;;  %v268_v21 = vld [vmem:[%s546_s3 + $0x30] sm:$0xff]  ;;  %v224_v22 = vld [vmem:[%s544_s1 + $0x18] sm:$0xff]  ;;  %v267_v23 = vld [vmem:[%s546_s3 + $0x28] sm:$0xff] }
  0x13   : > { %285 = vmatpush.msra.mxu1 %v274_v9  ;;  %v223_v24 = vld [vmem:[%s544_s1 + $0x10] sm:$0xff]  ;;  %v266_v25 = vld [vmem:[%s546_s3 + $0x20] sm:$0xff]  ;;  %v222_v26 = vld [vmem:[%s544_s1 + $0x8] sm:$0xff] }
  0x14   : > { %245 = vmatpush.msra.mxu0 %v232_v6  ;;  %v265_v27 = vld [vmem:[%s546_s3 + $0x18] sm:$0xff]  ;;  %v221_v28 = vld [vmem:[%s544_s1] sm:$0xff]  ;;  %v264_v30 = vld [vmem:[%s546_s3 + $0x10] sm:$0xff] }
  0x15   : > { %286 = vmatpush.msra.mxu1 %v273_v11  ;;  %v220_v29 = vld [vmem:[%s215_s6] sm:$0xff]  ;;  %v263_v31 = vld [vmem:[%s546_s3 + $0x8] sm:$0xff] }
  0x16   : > { %246 = vmatpush.msra.mxu0 %v231_v8  ;;  %v262_v32 = vld [vmem:[%s546_s3] sm:$0xff] }
  0x17   : > { %287 = vmatpush.msra.mxu1 %v272_v13  ;;  %v373_v33 = vld [vmem:[%s545_s2] ss:$0 sm:$0xff] }
  0x18   : > { %247 = vmatpush.msra.mxu0 %v230_v10  ;;  %v374_v37 = vld [vmem:[%s547_s4] ss:$0 sm:$0xff] }
  0x19   : > { %288 = vmatpush.msra.mxu1 %v271_v15 }
  0x1a   : > { %248 = vmatpush.msra.mxu0 %v229_v12 }
  0x1b   : > { %289 = vmatpush.msra.mxu1 %v270_v17 }
  0x1c   : > { %249 = vmatpush.msra.mxu0 %v228_v14 }
  0x1d   : > { %290 = vmatpush.msra.mxu1 %v269_v19 }
  0x1e   : > { %250 = vmatpush.msra.mxu0 %v227_v16 }
  0x1f   : > { %291 = vmatpush.msra.mxu1 %v268_v21 }
  0x20   : > { %251 = vmatpush.msra.mxu0 %v226_v18 }
  0x21   : > { %292 = vmatpush.msra.mxu1 %v267_v23 }
  0x22   : > { %252 = vmatpush.msra.mxu0 %v225_v20 }
  0x23   : > { %293 = vmatpush.msra.mxu1 %v266_v25 }
  0x24   : > { %253 = vmatpush.msra.mxu0 %v224_v22 }
  0x25   : > { %294 = vmatpush.msra.mxu1 %v265_v27 }
  0x26   : > { %254 = vmatpush.msra.mxu0 %v223_v24 }
  0x27   : > { %295 = vmatpush.msra.mxu1 %v264_v30 }
  0x28   : > { %255 = vmatpush.msra.mxu0 %v222_v26 }
  0x29   : > { %296 = vmatpush.msra.mxu1 %v263_v31 }
  0x2a   : > { %256 = vmatpush.msra.mxu0 %v221_v28 }
  0x2b   : > { %257 = vmatmul.f32.vlgmr.msra.gmra.mxu0 %v220_v29  ;;  %297 = vmatpush.msra.mxu1 %v262_v32 }
  0xa8   : > { %v258_v34 = vpop.f32.mrf.mxu0 }
  0xa9   : > { %v259_v35 = vadd.f32 %v373_v33, %v258_v34 }
  0xab   : > { %v261_v36 = vmax.f32 %v259_v35, 0.0 }
  0xad   : > { %298 = vmatmul.f32.vlgmr.msra.gmra.mxu1 %v261_v36 }
 0x12a   : > { %v299_v38 = vpop.f32.mrf.mxu1 }
 0x12b   : > { %v300_v39 = vadd.f32 %v374_v37, %v299_v38 }
 0x12d   : > { %302 = vst [vmem:[%s219_s26] sm:$0xff] %v300_v39 }
 0x12e PF: > { %s15_s18 = sadd.s32 1, %s381_s18  }
 0x12f   : > { %p12_p4 = scmp.ge.s32.totalorder %s15_s18, 4  }
 0x131   :  { %14 = sbr.rel (!%p12_p4) target bundleno = 1 (0x1), region = 70 }

</bundles_post_ra>
